<compile_context>
chip_gen: v6e
topology: v6e:2x2x1
jax: 0.10.0
libtpu: 0.0.40
codegen_flags: <defaults>
</compile_context>

<pallas_src>
import functools

import jax
import jax.numpy as jnp
from jax.experimental import pallas as pl
from jax.experimental.pallas import tpu as pltpu

C_IN, C_MID, C_OUT = 96, 24, 144
EPS = 1e-5


def _round_up(v, m):
    return (v + m - 1) // m * m


def _stats_kernel(x_ref, w1_ref, y_ref, sum_ref, sumsq_ref,
                  sum_sc, sumsq_sc, *, hw, tm):
    # x_ref:    [C_IN, TM]   f32 pixel tile (channels-first), cast to bf16 here
    # w1_ref:   [C_MID, C_IN] bf16
    # y_ref:    [C_MID, TM]  bf16 intermediate handed to pass B
    # sum_ref / sumsq_ref: [C_MID, 1] f32 per-batch outputs (written once/batch)
    # sum_sc / sumsq_sc:   [C_MID, 1] f32 VMEM accumulators
    j = pl.program_id(1)

    @pl.when(j == 0)
    def _():
        sum_sc[...] = jnp.zeros_like(sum_sc)
        sumsq_sc[...] = jnp.zeros_like(sumsq_sc)

    x = x_ref[...].astype(jnp.bfloat16)                       # free VPU cast
    y = jnp.dot(w1_ref[...], x,
                preferred_element_type=jnp.float32)           # [C_MID, TM] f32

    if hw % tm != 0:
        # Ragged last tile: lanes past the true pixel count hold garbage from
        # the out-of-bounds read; zero them before the sums.  (Out-of-bounds
        # lanes of y_ref / o_ref are dropped at writeback by Pallas.)
        lane = jax.lax.broadcasted_iota(jnp.int32, y.shape, 1)
        y = jnp.where(lane < (hw - j * tm), y, 0.0)

    y_ref[...] = y.astype(jnp.bfloat16)
    sum_sc[...] += jnp.sum(y, axis=1, keepdims=True)
    sumsq_sc[...] += jnp.sum(y * y, axis=1, keepdims=True)

    @pl.when(j == pl.num_programs(1) - 1)
    def _():
        sum_ref[...] = sum_sc[...]
        sumsq_ref[...] = sumsq_sc[...]


def _apply_kernel(y_ref, w2_ref, b_ref, o_ref):
    # y_ref: [C_MID, TM] bf16, w2_ref: [C_OUT, C_MID] bf16, b_ref: [C_OUT,1] f32
    o_ref[...] = (jnp.dot(w2_ref[...], y_ref[...],
                          preferred_element_type=jnp.float32) + b_ref[...])


def fused_conv_bn_conv(x_nchw, w1, gamma, beta, w2, *, tm=2048):
    """x_nchw: [N, 96, H, W] f32 -> [N, 144, H, W] f32 (training-mode BN)."""
    n, c, h, w = x_nchw.shape
    assert c == C_IN
    hw = h * w
    m_total = n * hw

    # Channels-first, spatially flattened: metadata-only reshape, no HBM copy,
    # no wrapper-side pad or dtype cast of the activation.
    x_cf = x_nchw.reshape(n, C_IN, hw)

    # Pixel tile: multiple of 128 lanes.  Ragged last tile handled in-kernel.
    tm = min(tm, _round_up(hw, 128))
    assert tm % 128 == 0
    num_tiles = pl.cdiv(hw, tm)

    w1_mat = w1.reshape(C_MID, C_IN)           # [24, 96]
    w2_mat = w2.reshape(C_OUT, C_MID)          # [144, 24]

    # ---------------- pass A: y = W1 @ x  +  BN statistics ----------------
    y_bf16, sum_y, sum_y2 = pl.pallas_call(
        functools.partial(_stats_kernel, hw=hw, tm=tm),
        out_shape=(jax.ShapeDtypeStruct((n, C_MID, hw), jnp.bfloat16),
                   jax.ShapeDtypeStruct((n, C_MID, 1), jnp.float32),
                   jax.ShapeDtypeStruct((n, C_MID, 1), jnp.float32)),
        grid=(n, num_tiles),
        in_specs=[
            pl.BlockSpec((None, C_IN, tm), lambda b, j: (b, 0, j)),
            pl.BlockSpec((C_MID, C_IN), lambda b, j: (0, 0)),
        ],
        out_specs=(pl.BlockSpec((None, C_MID, tm), lambda b, j: (b, 0, j)),
                   pl.BlockSpec((None, C_MID, 1), lambda b, j: (b, 0, 0)),
                   pl.BlockSpec((None, C_MID, 1), lambda b, j: (b, 0, 0))),
        scratch_shapes=[pltpu.VMEM((C_MID, 1), jnp.float32),
                        pltpu.VMEM((C_MID, 1), jnp.float32)],
        compiler_params=pltpu.CompilerParams(
            dimension_semantics=("parallel", "arbitrary")),
    )(x_cf, w1_mat.astype(jnp.bfloat16))

    # ---------------- fold BN into the second conv (tiny, plain JAX, f32) ----
    mean = jnp.sum(sum_y[:, :, 0], axis=0) / m_total                    # [24]
    var = jnp.maximum(jnp.sum(sum_y2[:, :, 0], axis=0) / m_total
                      - mean * mean, 0.0)                               # biased
    a = gamma * jax.lax.rsqrt(var + EPS)                                # [24]
    w2_scaled = (w2_mat * a[None, :]).astype(jnp.bfloat16)              # [144,24]
    bias = (w2_mat @ (beta - mean * a)).reshape(C_OUT, 1)               # [144,1]

    # ---------------- pass B: out = W2' @ y + bias ----------------
    out = pl.pallas_call(
        _apply_kernel,
        out_shape=jax.ShapeDtypeStruct((n, C_OUT, hw), jnp.float32),
        grid=(n, num_tiles),
        in_specs=[
            pl.BlockSpec((None, C_MID, tm), lambda b, j: (b, 0, j)),
            pl.BlockSpec((C_OUT, C_MID), lambda b, j: (0, 0)),
            pl.BlockSpec((C_OUT, 1), lambda b, j: (0, 0)),
        ],
        out_specs=pl.BlockSpec((None, C_OUT, tm), lambda b, j: (b, 0, j)),
        compiler_params=pltpu.CompilerParams(
            dimension_semantics=("parallel", "parallel")),
    )(y_bf16, w2_scaled, bias)

    return out.reshape(n, C_OUT, h, w)


# ------------------------- references for self-check -------------------------
def _reference_f32(x_nchw, w1, gamma, beta, w2):
    """Pure f32 replica of the PyTorch forward (training-mode BN)."""
    n, c, h, w = x_nchw.shape
    x_flat = jnp.transpose(x_nchw, (0, 2, 3, 1)).reshape(-1, C_IN)
    y = x_flat @ w1.reshape(C_MID, C_IN).T
    mean = jnp.mean(y, axis=0, keepdims=True)
    var = jnp.mean((y - mean) ** 2, axis=0, keepdims=True)
    y_n = (y - mean) * jax.lax.rsqrt(var + EPS) * gamma[None, :] + beta[None, :]
    out = y_n @ w2.reshape(C_OUT, C_MID).T
    return jnp.transpose(out.reshape(n, h, w, C_OUT), (0, 3, 1, 2))


def _reference_mixed(x_nchw, w1, gamma, beta, w2):
    """Same math path as the kernel (bf16 matmul inputs, f32 accum/stats)."""
    n, c, h, w = x_nchw.shape
    m = n * h * w
    x_cf = x_nchw.reshape(n, C_IN, h * w).astype(jnp.bfloat16)
    w1m = w1.reshape(C_MID, C_IN)
    w2m = w2.reshape(C_OUT, C_MID)
    y = jnp.einsum("oc,ncm->nom", w1m.astype(jnp.bfloat16), x_cf,
                   preferred_element_type=jnp.float32)
    mean = jnp.sum(y, axis=(0, 2)) / m
    var = jnp.maximum(jnp.sum(y * y, axis=(0, 2)) / m - mean * mean, 0.0)
    a = gamma * jax.lax.rsqrt(var + EPS)
    w2s = (w2m * a[None, :]).astype(jnp.bfloat16)
    b = w2m @ (beta - mean * a)
    out = jnp.einsum("oc,ncm->nom", w2s, y.astype(jnp.bfloat16),
                     preferred_element_type=jnp.float32) + b[None, :, None]
    return out.reshape(n, C_OUT, h, w)


if __name__ == "__main__":
    key = jax.random.PRNGKey(0)
    k_x, k_w1, k_w2, k_g, k_b = jax.random.split(key, 5)

    # Channel widths fixed by the module (96 -> 24 -> 144); small spatial size.
    # H*W = 400 with tm=128 exercises the multi-tile grid and the ragged
    # last-tile masking path (400 = 3*128 + 16).
    N, H, W = 2, 20, 20
    x = jax.random.normal(k_x, (N, C_IN, H, W), dtype=jnp.float32)

    bound1 = 1.0 / (C_IN ** 0.5)
    bound2 = 1.0 / (C_MID ** 0.5)
    w1 = jax.random.uniform(k_w1, (C_MID, C_IN, 1, 1), jnp.float32,
                            minval=-bound1, maxval=bound1)
    w2 = jax.random.uniform(k_w2, (C_OUT, C_MID, 1, 1), jnp.float32,
                            minval=-bound2, maxval=bound2)
    gamma = jax.random.uniform(k_g, (C_MID,), jnp.float32, minval=0.5, maxval=1.5)
    beta = 0.1 * jax.random.normal(k_b, (C_MID,), jnp.float32)

    out = fused_conv_bn_conv(x, w1, gamma, beta, w2, tm=128)
    out = jax.block_until_ready(out)
    assert out.shape == (N, C_OUT, H, W), out.shape

    ref_mp = _reference_mixed(x, w1, gamma, beta, w2)
    ref_f32 = _reference_f32(x, w1, gamma, beta, w2)
    err_mp = float(jnp.max(jnp.abs(out - ref_mp)))
    err_f32 = float(jnp.max(jnp.abs(out - ref_f32)))
    # Tight check vs. the same mixed-precision math; loose check vs. full-f32
    # PyTorch semantics (difference is the bf16 quantization of x, y, weights).
    assert jnp.allclose(out, ref_mp, atol=5e-3, rtol=5e-3), err_mp
    assert jnp.allclose(out, ref_f32, atol=5e-2, rtol=5e-2), err_f32

    print("KERNEL_OK")
</pallas_src>

<mosaic_0001>
module attributes {stable_mosaic.version = 11 : i64} {
  func.func @_stats_kernel(%arg0: i32, %arg1: i32, %arg2: memref<1x96x128xf32, #tpu.memory_space<vmem>>, %arg3: memref<24x96xbf16, #tpu.memory_space<vmem>>, %arg4: memref<1x24x128xbf16, #tpu.memory_space<vmem>>, %arg5: memref<1x24x1xf32, #tpu.memory_space<vmem>>, %arg6: memref<1x24x1xf32, #tpu.memory_space<vmem>>, %arg7: memref<24x1xf32, #tpu.memory_space<vmem>>, %arg8: memref<24x1xf32, #tpu.memory_space<vmem>>) attributes {dimension_semantics = [#tpu.dimension_semantics<parallel>, #tpu.dimension_semantics<arbitrary>], iteration_bounds = array<i64: 2, 4>, scalar_prefetch = 0 : i64, scratch_operands = 2 : i64, tpu.core_type = #tpu.core_type<tc>, window_params = [{transform_indices = @transform_0, window_bounds = array<i64: 1, 96, 128>}, {pipeline_mode = #tpu.pipeline_mode<synchronous>, transform_indices = @transform_1, window_bounds = array<i64: 24, 96>}, {transform_indices = @transform_2, window_bounds = array<i64: 1, 24, 128>}, {transform_indices = @transform_3, window_bounds = array<i64: 1, 24, 1>}, {transform_indices = @transform_4, window_bounds = array<i64: 1, 24, 1>}]} {
    %c0_i32 = arith.constant 0 : i32
    %0 = arith.cmpi eq, %arg1, %c0_i32 : i32
    %1 = arith.extui %0 : i1 to i32
    %c0_i32_0 = arith.constant 0 : i32
    %2 = arith.cmpi ne, %1, %c0_i32_0 : i32
    scf.if %2 {
      %cst_20 = arith.constant 0.000000e+00 : f32
      %33 = vector.broadcast %cst_20 : f32 to vector<24x1xf32>
      %c0_21 = arith.constant 0 : index
      %c0_22 = arith.constant 0 : index
      %34 = vector.load %arg7[%c0_21, %c0_22] : memref<24x1xf32, #tpu.memory_space<vmem>>, vector<24x1xf32>
      tpu.vector_store %arg7[%c0_21, %c0_22], %33 {strides = array<i32>} : memref<24x1xf32, #tpu.memory_space<vmem>>, vector<24x1xf32>,
      %cst_23 = arith.constant 0.000000e+00 : f32
      %35 = vector.broadcast %cst_23 : f32 to vector<24x1xf32>
      %c0_24 = arith.constant 0 : index
      %c0_25 = arith.constant 0 : index
      %36 = vector.load %arg8[%c0_24, %c0_25] : memref<24x1xf32, #tpu.memory_space<vmem>>, vector<24x1xf32>
      tpu.vector_store %arg8[%c0_24, %c0_25], %35 {strides = array<i32>} : memref<24x1xf32, #tpu.memory_space<vmem>>, vector<24x1xf32>,
    } else {
    }
    %c0 = arith.constant 0 : index
    %c0_1 = arith.constant 0 : index
    %c0_2 = arith.constant 0 : index
    %3 = vector.load %arg2[%c0, %c0_1, %c0_2] : memref<1x96x128xf32, #tpu.memory_space<vmem>>, vector<1x96x128xf32>
    %4 = vector.shape_cast %3 : vector<1x96x128xf32> to vector<96x128xf32>
    %5 = arith.truncf %4 : vector<96x128xf32> to vector<96x128xbf16>
    %c0_3 = arith.constant 0 : index
    %c0_4 = arith.constant 0 : index
    %6 = vector.load %arg3[%c0_3, %c0_4] : memref<24x96xbf16, #tpu.memory_space<vmem>>, vector<24x96xbf16>
    %cst = arith.constant dense<0.000000e+00> : vector<24x128xf32>
    %7 = tpu.matmul %6, %5, %cst {dimension_numbers = #tpu.dot_dimension_numbers<[1], [0], [0], [1], [0, 0, 1, 1], [], []>} : vector<24x96xbf16>, vector<96x128xbf16>, vector<24x128xf32> -> vector<24x128xf32>
    %8 = tpu.iota {dimensions = array<i32: 1>} : vector<24x128xi32>
    %c128_i32 = arith.constant 128 : i32
    %9 = arith.muli %arg1, %c128_i32 : i32
    %c400_i32 = arith.constant 400 : i32
    %10 = arith.subi %c400_i32, %9 : i32
    %11 = vector.broadcast %10 : i32 to vector<24x128xi32>
    %12 = arith.cmpi slt, %8, %11 : vector<24x128xi32>
    %cst_5 = arith.constant 0.000000e+00 : f32
    %13 = vector.broadcast %cst_5 : f32 to vector<24x128xf32>
    %14 = arith.select %12, %7, %13 : vector<24x128xi1>, vector<24x128xf32>
    %15 = arith.truncf %14 : vector<24x128xf32> to vector<24x128xbf16>
    %c0_6 = arith.constant 0 : index
    %c0_7 = arith.constant 0 : index
    %c0_8 = arith.constant 0 : index
    %16 = vector.load %arg4[%c0_6, %c0_7, %c0_8] : memref<1x24x128xbf16, #tpu.memory_space<vmem>>, vector<1x24x128xbf16>
    %17 = vector.shape_cast %16 : vector<1x24x128xbf16> to vector<24x128xbf16>
    %18 = vector.shape_cast %15 : vector<24x128xbf16> to vector<1x24x128xbf16>
    tpu.vector_store %arg4[%c0_6, %c0_7, %c0_8], %18 {strides = array<i32>} : memref<1x24x128xbf16, #tpu.memory_space<vmem>>, vector<1x24x128xbf16>,
    %c0_9 = arith.constant 0 : index
    %c0_10 = arith.constant 0 : index
    %19 = vector.load %arg7[%c0_9, %c0_10] : memref<24x1xf32, #tpu.memory_space<vmem>>, vector<24x1xf32>
    %cst_11 = arith.constant dense<0.000000e+00> : vector<24xf32>
    %20 = vector.multi_reduction <add>, %14, %cst_11 [1] : vector<24x128xf32> to vector<24xf32>
    %21 = vector.shape_cast %20 : vector<24xf32> to vector<24x1xf32>
    %22 = arith.addf %19, %21 : vector<24x1xf32>
    %c0_12 = arith.constant 0 : index
    %c0_13 = arith.constant 0 : index
    %23 = vector.load %arg7[%c0_12, %c0_13] : memref<24x1xf32, #tpu.memory_space<vmem>>, vector<24x1xf32>
    tpu.vector_store %arg7[%c0_12, %c0_13], %22 {strides = array<i32>} : memref<24x1xf32, #tpu.memory_space<vmem>>, vector<24x1xf32>,
    %c0_14 = arith.constant 0 : index
    %c0_15 = arith.constant 0 : index
    %24 = vector.load %arg8[%c0_14, %c0_15] : memref<24x1xf32, #tpu.memory_space<vmem>>, vector<24x1xf32>
    %25 = arith.mulf %14, %14 : vector<24x128xf32>
    %cst_16 = arith.constant dense<0.000000e+00> : vector<24xf32>
    %26 = vector.multi_reduction <add>, %25, %cst_16 [1] : vector<24x128xf32> to vector<24xf32>
    %27 = vector.shape_cast %26 : vector<24xf32> to vector<24x1xf32>
    %28 = arith.addf %24, %27 : vector<24x1xf32>
    %c0_17 = arith.constant 0 : index
    %c0_18 = arith.constant 0 : index
    %29 = vector.load %arg8[%c0_17, %c0_18] : memref<24x1xf32, #tpu.memory_space<vmem>>, vector<24x1xf32>
    tpu.vector_store %arg8[%c0_17, %c0_18], %28 {strides = array<i32>} : memref<24x1xf32, #tpu.memory_space<vmem>>, vector<24x1xf32>,
    %c3_i32 = arith.constant 3 : i32
    %30 = arith.cmpi eq, %arg1, %c3_i32 : i32
    %31 = arith.extui %30 : i1 to i32
    %c0_i32_19 = arith.constant 0 : i32
    %32 = arith.cmpi ne, %31, %c0_i32_19 : i32
    scf.if %32 {
      %c0_20 = arith.constant 0 : index
      %c0_21 = arith.constant 0 : index
      %33 = vector.load %arg7[%c0_20, %c0_21] : memref<24x1xf32, #tpu.memory_space<vmem>>, vector<24x1xf32>
      %c0_22 = arith.constant 0 : index
      %c0_23 = arith.constant 0 : index
      %c0_24 = arith.constant 0 : index
      %34 = vector.load %arg5[%c0_22, %c0_23, %c0_24] : memref<1x24x1xf32, #tpu.memory_space<vmem>>, vector<1x24x1xf32>
      %35 = vector.shape_cast %34 : vector<1x24x1xf32> to vector<24x1xf32>
      %36 = vector.shape_cast %33 : vector<24x1xf32> to vector<1x24x1xf32>
      tpu.vector_store %arg5[%c0_22, %c0_23, %c0_24], %36 {strides = array<i32>} : memref<1x24x1xf32, #tpu.memory_space<vmem>>, vector<1x24x1xf32>,
      %c0_25 = arith.constant 0 : index
      %c0_26 = arith.constant 0 : index
      %37 = vector.load %arg8[%c0_25, %c0_26] : memref<24x1xf32, #tpu.memory_space<vmem>>, vector<24x1xf32>
      %c0_27 = arith.constant 0 : index
      %c0_28 = arith.constant 0 : index
      %c0_29 = arith.constant 0 : index
      %38 = vector.load %arg6[%c0_27, %c0_28, %c0_29] : memref<1x24x1xf32, #tpu.memory_space<vmem>>, vector<1x24x1xf32>
      %39 = vector.shape_cast %38 : vector<1x24x1xf32> to vector<24x1xf32>
      %40 = vector.shape_cast %37 : vector<24x1xf32> to vector<1x24x1xf32>
      tpu.vector_store %arg6[%c0_27, %c0_28, %c0_29], %40 {strides = array<i32>} : memref<1x24x1xf32, #tpu.memory_space<vmem>>, vector<1x24x1xf32>,
    } else {
    }
    return
  }
  func.func @transform_0(%arg0: i32, %arg1: i32) -> (i32, i32, i32) {
    %c0_i32 = arith.constant 0 : i32
    %c0_i32_0 = arith.constant 0 : i32
    return %arg0, %c0_i32, %arg1 : i32, i32, i32
  }
  func.func @transform_1(%arg0: i32, %arg1: i32) -> (i32, i32) {
    %c0_i32 = arith.constant 0 : i32
    %c0_i32_0 = arith.constant 0 : i32
    %c0_i32_1 = arith.constant 0 : i32
    return %c0_i32, %c0_i32_0 : i32, i32
  }
  func.func @transform_2(%arg0: i32, %arg1: i32) -> (i32, i32, i32) {
    %c0_i32 = arith.constant 0 : i32
    %c0_i32_0 = arith.constant 0 : i32
    return %arg0, %c0_i32, %arg1 : i32, i32, i32
  }
  func.func @transform_3(%arg0: i32, %arg1: i32) -> (i32, i32, i32) {
    %c0_i32 = arith.constant 0 : i32
    %c0_i32_0 = arith.constant 0 : i32
    %c0_i32_1 = arith.constant 0 : i32
    return %arg0, %c0_i32, %c0_i32_0 : i32, i32, i32
  }
  func.func @transform_4(%arg0: i32, %arg1: i32) -> (i32, i32, i32) {
    %c0_i32 = arith.constant 0 : i32
    %c0_i32_0 = arith.constant 0 : i32
    %c0_i32_1 = arith.constant 0 : i32
    return %arg0, %c0_i32, %c0_i32_0 : i32, i32, i32
  }
}

</mosaic_0001>

<bundles_post_ra>
// kernel: tpu_custom_call.1
= control target key start
LH: loop header
LB: loop body
LE: loop exit
PB: predicated region body
PF: predicated region fallthrough
CT: control target
= control target key end

     0   :  { %s1234_s0 = inlined_call_operand.hbm [shape: f32[2,96,400], index: 0, kind: input, shape index: {}]   ;;  %s1235_s1 = inlined_call_operand.hbm [shape: bf16[24,96], index: 1, kind: input, shape index: {}]   ;;  %s1236_s2 = inlined_call_operand.hbm [shape: bf16[2,24,400], index: 2, kind: output, shape index: {0}]   ;;  %s1237_s3 = inlined_call_operand.vmem [shape: f32[2,24,1], index: 3, kind: output, shape index: {1}]   ;;  %s1238_s4 = inlined_call_operand.vmem [shape: f32[2,24,1], index: 4, kind: output, shape index: {2}]  }
   0x1   :  { %1249 = sst [smem:[#allocation18_spill]] %s1235_s1 }
   0x2   :  { %1250 = sst [smem:[#allocation19_spill]] %s1236_s2 }
   0x3   :  { %10 = vsyncpa [#allocation5], 0 }
   0x4   :  { %12 = vsyncpa [#allocation5 + $0x1], 0 }
   0x5   :  { %13 = vsyncpa [#allocation8], 0 }
   0x6   :  { %14 = vsyncpa [#allocation6], 0 }
   0x7   :  { %16 = vsyncpa [#allocation6 + $0x1], 0  ;;  %s977_s15 = smov 0   ;;  %s979_s16 = smov 0  }
   0x8   :  { %s981_s17 = smov 0   ;;  %s983_s18 = smov 0  }
   0x9   :  { %s985_s19 = smov 0   ;;  %s987_s20 = smov 0  }
   0xa   :  { %s989_s21 = smov 0   ;;  %s991_s22 = smov 0  }
   0xb LB: > { %1251 = sst [smem:[#allocation13_spill]] %s910_s15  ;;  %s623_s23 = sadd.s32 4294967295, %s938_s22   ;;  %s938_s22 = sphi %s991_s22, %s22_s22   ;;  %s934_s21 = sphi %s989_s21, %s1282_s21   ;;  %s930_s20 = sphi %s987_s20, %s1281_s20   ;;  %s926_s19 = sphi %s985_s19, %s1280_s19   ;;  %s922_s18 = sphi %s983_s18, %s1279_s18   ;;  %s918_s17 = sphi %s981_s17, %s1278_s17   ;;  %s914_s16 = sphi %s979_s16, %s1277_s16   ;;  %s910_s15 = sphi %s977_s15, %s1276_s15  }
   0xc   : > { %1252 = sst [smem:[#allocation14_spill]] %s938_s22  ;;  %s624_s24 = sadd.s32 4294967294, %s938_s22  }
   0xd   : > { %p50_p0 = scmp.ne.s32.totalorder %s918_s17, %s914_s16  ;;  %p51_p1 = scmp.eq.s32.totalorder %s938_s22, 0 }
   0xe   : > { %p56_p2 = scmp.ne.s32.totalorder %s914_s16, %s910_s15  ;;  %p1025_p3 = scmp.eq.s32.totalorder %s623_s23, 0 }
   0xf   : > { %p103_p4 = scmp.eq.s32.totalorder %s623_s23, 7  ;;  %p1029_p5 = por %p51_p1, %p50_p0 }
  0x10   : > { %p109_p6 = scmp.eq.s32.totalorder %s624_s24, 7  ;;  %p1035_p7 = por %p1025_p3, %p56_p2 }
  0x11   : > { %p1039_p8 = por %p103_p4, %p50_p0  ;;  %p625_p10 = scmp.ge.s32.totalorder %s938_s22, 1 }
  0x12   : > { %s1255_s28 = scalar_select %p1035_p7, 1, 0 }
  0x13   : > { %s1256_s29 = scalar_select %p1039_p8, 1, 0 }
  0x14   : > { %p1043_p9 = por %p109_p6, %p56_p2  ;;  %p168_p11 = scmp.lt.s32.totalorder %s938_s22, 9 }
  0x15   : > { %s940_s6 = smov [#allocation7]   ;;  %p705_p0 = scmp.lt.s32.totalorder %s938_s22, 8 }
  0x16   : > { %s1257_s30 = scalar_select %p1043_p9, 1, 0 }
  0x17   : > { %p1049_p12 = pnand %p625_p10, %p168_p11  ;;  %s180_s7 = sshll.u32 %s940_s6, 4  ;;  %s181_s7 = int_to_ptr.vmem [resolvable:$true] %s180_s7 }
  0x18   : > { %1258 = sst [smem:[#allocation15_spill]] %s1257_s30  ;;  %p1064_p2 = pnand %p705_p0, %p1029_p5 }
  0x19   : > { %s1259_s5 = scalar_select %p1049_p12, 1, 0 }
  0x1a   : > { %p692_p13 = pneg %p1049_p12  ;;  %s795_s10 = scalar_lea.vmem %s181_s7, 192 }
  0x1b   : > { %p796_p6 = scmp.ne.s32.totalorder %s181_s7, %s795_s10  ;;  %p803_p9 = scmp.lt.s32.totalorder %s181_s7, %s181_s7 }
  0x1c   : > { %p1058_p1 = pnand %p692_p13, %p1025_p3  ;;  %p804_p8 = scmp.lt.s32.totalorder %s795_s10, %s795_s10 }
  0x1e   : > { %p786_p4 = pneg %p1058_p1  ;;  %p805_p7 = por %p804_p8, %p803_p9 }
  0x20   : > { %p798_p10 = pnand %p796_p6, %p786_p4 }
  0x22   : > { %p799_p11 = pneg %p798_p10 }
  0x24   : > { %p806_p12 = pnand %p805_p7, %p799_p11 }
  0x26   : > { %809 = shalt.err (!%p806_p12)
}
  0x27   : > { %s941_s11 = smov 64   ;;  %s942_s12 = smov 4  }
  0x28   : > { %s1262_s1 = sld [smem:[#allocation18_spill]]  ;;  %s31_s23 = sadd.s32 1, %s930_s20 }
  0x29   : > { %p32_p5 = scmp.ge.s32.totalorder %s31_s23, 4  ;;  %s34_s24 = sadd.s32 1, %s934_s21 }
  0x2a   : > { %s194_s27 = sand.u32 1, %s918_s17   ;;  %s679_s6 = smul.u32 48, %s934_s21 }
  0x2b   : > { %s1284_s23 = smov (%p32_p5, %s31_s23), 0  ;;  %s1286_s24 = smov (!%p32_p5, %s34_s24), %s934_s21 }
  0x2c   : > { %1263 = sst [smem:[#allocation16_spill]] %s1284_s23  ;;  %s39_s10 = ssub.s32 %s930_s20, %s1284_s23 }
  0x2d   : > { %p36_p7 = scmp.ge.s32.totalorder %s1286_s24, 2  ;;  %s678_s25 = smul.u32 96, %s194_s27 }
  0x2e   : > { %695 = dma.hbm_to_vmem [thread:$0]  (!%p1058_p1), %s1262_s1, 192, %s181_s7, [#allocation8], %s941_s11, %s941_s11, %s942_s12  }
  0x2f   : > { %s203_s8 = sadd.s32 %s930_s20, %s679_s6  ;;  %s1288_s24 = smov (%p36_p7, %s1286_s24), 0 }
  0x30   : > { %1264 = sst [smem:[#allocation17_spill]] %s1288_s24  ;;  %s628_s7 = sshll.u32 %s203_s8, 7 }
  0x31   : > { %s38_s11 = ssub.s32 %s934_s21, %s1288_s24  ;;  %s1092_s14 = scalar_lea.hbm %s1234_s0, %s628_s7 }
  0x32   : > { %s40_s1 = sor.u32 %s39_s10, %s38_s11  ;;  %s198_s30 = scalar_lea.vmem [#allocation4], %s678_s25 }
  0x33   : > { %s206_s15 = sshll.u32 %s198_s30, 4  ;;  %p41_p8 = scmp.eq.s32.totalorder %s40_s1, 0  ;;  %s207_s15 = int_to_ptr.vmem [resolvable:$true] %s206_s15 }
  0x34   : > { %s1265_s22 = sadd.s32 1, %s918_s17  ;;  %s195_s2 = scalar_lea.sflag [#allocation5], %s194_s27 }
  0x35   : > { %s1097_s23 = scalar_select %p41_p8, %s918_s17, %s1265_s22  }
  0x36   : > { %p812_p9 = pneg %p1064_p2  ;;  %s823_s6 = scalar_lea.vmem %s207_s15, 1536 }
  0x37   : > { %p824_p12 = scmp.ne.s32.totalorder %s207_s15, %s823_s6  ;;  %s943_s8 = smov [#allocation4]  }
  0x38   : > { %s828_s24 = sshll.u32 %s943_s8, 4  ;;  %s829_s24 = int_to_ptr.vmem [resolvable:$false] %s828_s24 }
  0x39   : > { %p826_p13 = pnand %p824_p12, %p812_p9  ;;  %s830_s7 = scalar_lea.vmem %s829_s24, 3072 }
  0x3a   : > { %p831_p1 = scmp.lt.s32.totalorder %s207_s15, %s829_s24  ;;  %p832_p4 = scmp.lt.s32.totalorder %s830_s7, %s823_s6 }
  0x3b   : > { %p827_p0 = pneg %p826_p13 }
  0x3c   : > { %p833_p6 = por %p832_p4, %p831_p1 }
  0x3e   : > { %p834_p10 = pnand %p833_p6, %p827_p0 }
  0x40   : > { %837 = shalt.err (!%p834_p10)
}
  0x41   : > { %s944_s1 = smov 512   ;;  %s945_s22 = smov 128  }
  0x42   : > { %s946_s25 = smov 8   ;;  %p1266_p11 = scmp.ne.s32.totalorder %s1259_s5, 0 }
  0x43   : > { %699 = dma.hbm_to_vmem [thread:$0]  (!%p1064_p2), %s1092_s14, 1536, %s207_s15, %s195_s2, %s944_s1, %s945_s22, %s946_s25  }
  0x44   : > { %218 = sbr.rel (%p1266_p11) target bundleno = 496 (0x1f0), region = 28  ;;  %s1107_s30 = sand.u32 (!%p1266_p11), 1, %s914_s16  }
  0x45   : > { %s680_s24 = smul.u32 (!%p1266_p11), 96, %s1107_s30  ;;  %s221_s27 = scalar_lea.sflag (!%p1266_p11), [#allocation5], %s1107_s30 }
  0x46   : > { %p1267_p5 = scmp.ne.s32.totalorder (!%p1266_p11), %s1255_s28, 0 }
  0x47   : > { %s1111_s10 = scalar_lea.vmem (!%p1266_p11), [#allocation4], %s680_s24 }
  0x49   : > { %897 = dma.done.wait (%p1267_p5), %s221_s27, 1536  }
  0x4a   : > { %899 = vsyncadd (%p1267_p5), %s221_s27, 4294965760 }
  0x4b   : > { %901 = dma.done.wait (%p1025_p3), [#allocation8], 192  }
  0x4c   : > { %903 = vsyncadd (%p1025_p3), [#allocation8], 4294967104  ;;  %s681_s2 = smul.u32 12, %s1107_s30  ;;  %p263_p2 = scmp.lt.s32.totalorder %s926_s19, 1 }
  0x4d   : > { %p633_p3 = scmp.ne.s32.totalorder %s922_s18, 0 }
  0x4e   : > { %s264_s15 = scalar_select %p263_p2, %s926_s19, 1 }
  0x4f   : > { %s1134_s6 = scalar_lea.vmem [#allocation9], %s681_s2  ;;  %277 = sbr.rel (%p633_p3) target bundleno = 88 (0x58), region = 40 }
  0x50   : > { %s682_s5 = smul.u32 24, %s264_s15 }
  0x52   : > { %s1127_s12 = scalar_lea.vmem %s1237_s3, %s682_s5  ;;  %s1132_s14 = scalar_lea.vmem %s1238_s4, %s682_s5 }
  0x54   : > { %vm278_vm0 = vcmask 7168   ;;  %v947_v0 = vmov 0.0  }
  0x55   : > { %279 = vst.msk [vmem:[#allocation2] sm:$0xff] %vm278_vm0, %v947_v0  ;;  %280 = vst.msk [vmem:[#allocation2 + $0x8] sm:$0xff] %vm278_vm0, %v947_v0 }
  0x56   : > { %281 = vst.msk [vmem:[#allocation2 + $0x10] sm:$0xff] %vm278_vm0, %v947_v0  ;;  %282 = vst.msk [vmem:[#allocation3] sm:$0xff] %vm278_vm0, %v947_v0 }
  0x57   : > { %283 = vst.msk [vmem:[#allocation3 + $0x8] sm:$0xff] %vm278_vm0, %v947_v0  ;;  %284 = vst.msk [vmem:[#allocation3 + $0x10] sm:$0xff] %vm278_vm0, %v947_v0 }
  0x58 PF: > { %v295_v1 = vld [vmem:[%s1111_s10 + $0x50] sm:$0xff]  ;;  %v296_v2 = vld [vmem:[%s1111_s10 + $0x58] sm:$0xff]  ;;  %v293_v3 = vld [vmem:[%s1111_s10 + $0x40] sm:$0xff]  ;;  %vm314_vm1 = vcmask 785408   ;;  %s638_s26 = sshll.u32 %s922_s18, 7  ;;  %v369_v21 = vlaneseq  ;;  %vm406_vm3 = vcmask 7168  }
  0x59   : > { %v302_v4 = vpack.c.bf16 %v296_v2, %v295_v1  ;;  %v294_v5 = vld [vmem:[%s1111_s10 + $0x48] sm:$0xff]  ;;  %v291_v7 = vld [vmem:[%s1111_s10 + $0x30] sm:$0xff]  ;;  %v292_v8 = vld [vmem:[%s1111_s10 + $0x38] sm:$0xff]  ;;  %s372_s8 = ssub.s32 400, %s638_s26  ;;  %p642_p7 = scmp.ne.s32.totalorder %s922_s18, 3 }
  0x5a   : > { %v301_v6 = vpack.c.bf16 %v294_v5, %v293_v3  ;;  %v782_v9 = vld [vmem:[#allocation7] sm:$0xff]   ;;  %v300_v10 = vpack.c.bf16 %v292_v8, %v291_v7  ;;  %v290_v12 = vld [vmem:[%s1111_s10 + $0x28] sm:$0xff]  ;;  %v287_v14 = vld [vmem:[%s1111_s10 + $0x10] sm:$0xff]  ;;  %v370_v22 = vand.u32 127, %v369_v21  ;;  %v373_v23 = vstv %s372_s8 }
  0x5b   : > { %662 = vmatprep.subr.bf16.mxu0 %v302_v4  ;;  %v289_v11 = vld [vmem:[%s1111_s10 + $0x20] sm:$0xff]  ;;  %674 = vmatprep.mubr.msk.bf16.mxu0 %vm314_vm1, %v782_v9  ;;  %v288_v15 = vld [vmem:[%s1111_s10 + $0x18] sm:$0xff]  ;;  %v286_v18 = vld [vmem:[%s1111_s10 + $0x8] sm:$0xff] }
  0x5c   : > { %663 = vmatpush3.bf16.msra.mxu0 %v302_v4  ;;  %v299_v13 = vpack.c.bf16 %v290_v12, %v289_v11  ;;  %v298_v16 = vpack.c.bf16 %v288_v15, %v287_v14  ;;  %v285_v17 = vld [vmem:[%s1111_s10] sm:$0xff]  ;;  %v783_v20 = vld [vmem:[#allocation7 + $0x8] ss:$0 sps:$4 sm:$0xff]   ;;  %vm374_vm2 = vcmp.lt.s32.totalorder %v370_v22, %v373_v23  ;;  %v394_v38 = vld [vmem:[#allocation2] sm:$0xff] }
  0x5d   : > { %664 = vmatprep.subr.bf16.mxu0 %v301_v6  ;;  %v297_v19 = vpack.c.bf16 %v286_v18, %v285_v17  ;;  %v396_v36 = vld [vmem:[#allocation2 + $0x10] sm:$0xff]  ;;  %v410_v41 = vld [vmem:[#allocation3] sm:$0xff]  ;;  %v395_v44 = vld [vmem:[#allocation2 + $0x8] sm:$0xff] }
  0x5e   : > { %v412_v47 = vld [vmem:[#allocation3 + $0x10] sm:$0xff]  ;;  %v411_v50 = vld [vmem:[#allocation3 + $0x8] sm:$0xff] }
  0x60   : > { %665 = vmatpush3.bf16.msra.mxu0 %v301_v6 }
  0x61   : > { %666 = vmatprep.subr.bf16.mxu0 %v300_v10 }
  0x64   : > { %667 = vmatpush3.bf16.msra.mxu0 %v300_v10 }
  0x65   : > { %668 = vmatprep.subr.bf16.mxu0 %v299_v13 }
  0x68   : > { %669 = vmatpush3.bf16.msra.mxu0 %v299_v13 }
  0x69   : > { %670 = vmatprep.subr.bf16.mxu0 %v298_v16 }
  0x6c   : > { %671 = vmatpush3.bf16.msra.mxu0 %v298_v16 }
  0x6d   : > { %672 = vmatprep.subr.bf16.mxu0 %v297_v19 }
  0x70   : > { %673 = vmatpush3.bf16.msra.mxu0 %v297_v19 }
  0x73   : > { %675 = vmatmul.mubr.msk.bf16.vlgmr.msra.gmra.mxu0 %vm314_vm1, %v783_v20 }
 0x133   : > { %v676_v24 = vpop.f32.mrf.mxu0 }
 0x134   : > { %v377_v25 = vsel %vm374_vm2, %v676_v24, 0.0 }
 0x135   : > { %v648_v26 = vpack.c.bf16 %v377_v25, %v377_v25  ;;  %401 = vadd.xlane.f32.xlu1 %v377_v25  ;;  %v355_v27 = vpop.f32.mrf.mxu0  ;;  %v415_v34 = vmul.f32 %v377_v25, %v377_v25 }
 0x136   : > { %v375_v28 = vsel %vm374_vm2, %v355_v27, 0.0 }
 0x137   : > { %393 = vst [vmem:[%s1134_s6 + $0x8] sm:$0xf] %v648_v26  ;;  %397 = vadd.xlane.f32.xlu0 %v375_v28  ;;  %v677_v29 = vpop.f32.mrf.mxu0  ;;  %v413_v30 = vmul.f32 %v375_v28, %v375_v28 }
 0x139   : > { %416 = vadd.xlane.f32.xlu1 %v413_v30  ;;  %v358_v31 = vpop.f32.mrf.mxu0 }
 0x13a   : > { %v376_v32 = vsel %vm374_vm2, %v358_v31, 0.0 }
 0x13b   : > { %v652_v33 = vpack.c.bf16 %v376_v32, %v375_v28  ;;  %399 = vadd.xlane.f32.xlu0 %v376_v32  ;;  %v414_v35 = vmul.f32 %v376_v32, %v376_v32 }
 0x13d   : > { %653 = vst [vmem:[%s1134_s6] sm:$0xff] %v652_v33   ;;  %420 = vadd.xlane.f32.xlu1 %v415_v34 }
 0x13f   : > { %418 = vadd.xlane.f32.xlu0 %v414_v35 }
 0x1be   : > { %v402_v37 = vpop.xlane.xlu1 %401 }
 0x1bf   : > { %v405_v39 = vadd.f32 %v402_v37, %v396_v36 }
 0x1c0   : > { %v398_v40 = vpop.xlane.xlu0 %397 }
 0x1c1   : > { %409 = vst.msk [vmem:[#allocation2 + $0x10] sm:$0xff] %vm406_vm3, %v405_v39  ;;  %v403_v42 = vadd.f32 %v398_v40, %v394_v38 }
 0x1c2   : > { %v417_v43 = vpop.xlane.xlu1 %416 }
 0x1c3   : > { %407 = vst.msk [vmem:[#allocation2] sm:$0xff] %vm406_vm3, %v403_v42  ;;  %v422_v45 = vadd.f32 %v417_v43, %v410_v41 }
 0x1c4   : > { %v400_v46 = vpop.xlane.xlu0 %399 }
 0x1c5   : > { %425 = vst.msk [vmem:[#allocation3] sm:$0xff] %vm406_vm3, %v422_v45  ;;  %v404_v48 = vadd.f32 %v400_v46, %v395_v44 }
 0x1c6   : > { %v421_v49 = vpop.xlane.xlu1 %420 }
 0x1c7   : > { %408 = vst.msk [vmem:[#allocation2 + $0x8] sm:$0xff] %vm406_vm3, %v404_v48  ;;  %v424_v51 = vadd.f32 %v421_v49, %v412_v47  ;;  %431 = sbr.rel (%p642_p7) target bundleno = 468 (0x1d4), region = 44 }
 0x1c8   : > { %v419_v52 = vpop.xlane.xlu0 %418 }
 0x1c9   : > { %427 = vst.msk [vmem:[#allocation3 + $0x10] sm:$0xff] %vm406_vm3, %v424_v51  ;;  %v423_v53 = vadd.f32 %v419_v52, %v411_v50 }
 0x1cb   : > { %426 = vst.msk [vmem:[#allocation3 + $0x8] sm:$0xff] %vm406_vm3, %v423_v53 }
 0x1cc   : > { %v432_v54 = vld [vmem:[#allocation2] sm:$0xff]  ;;  %v434_v56 = vld [vmem:[#allocation2 + $0x10] sm:$0xff]  ;;  %v438_v57 = vld [vmem:[#allocation3] sm:$0xff] }
 0x1cd   : > { %435 = vst.msk [vmem:[%s1127_s12] sm:$0xff] %vm406_vm3, %v432_v54  ;;  %437 = vst.msk [vmem:[%s1127_s12 + $0x10] sm:$0xff] %vm406_vm3, %v434_v56 }
 0x1ce   : > { %v433_v55 = vld [vmem:[#allocation2 + $0x8] sm:$0xff]  ;;  %441 = vst.msk [vmem:[%s1132_s14] sm:$0xff] %vm406_vm3, %v438_v57 }
 0x1cf   : > { %436 = vst.msk [vmem:[%s1127_s12 + $0x8] sm:$0xff] %vm406_vm3, %v433_v55 }
 0x1d0   : > { %v440_v59 = vld [vmem:[#allocation3 + $0x10] sm:$0xff] }
 0x1d1   : > { %443 = vst.msk [vmem:[%s1132_s14 + $0x10] sm:$0xff] %vm406_vm3, %v440_v59 }
 0x1d2   : > { %v439_v58 = vld [vmem:[#allocation3 + $0x8] sm:$0xff] }
 0x1d3   : > { %442 = vst.msk [vmem:[%s1132_s14 + $0x8] sm:$0xff] %vm406_vm3, %v439_v58 }
 0x1d4 PF: > { %s683_s7 = smul.u32 12, %s926_s19  ;;  %s469_s1 = sshll.u32 %s1134_s6, 4  ;;  %s1176_s1 = int_to_ptr.vmem [resolvable:$true] %s469_s1 }
 0x1d5   : > { %s1268_s10 = sld [smem:[#allocation19_spill]]  ;;  %s445_s15 = scalar_lea.sflag [#allocation6], %s1107_s30 }
 0x1d6   : > { %s466_s22 = sadd.s32 %s922_s18, %s683_s7  ;;  %s838_s5 = scalar_lea.vmem %s1176_s1, 192 }
 0x1d7   : > { %s643_s25 = sshll.u32 %s466_s22, 6  ;;  %p839_p8 = scmp.ne.s32.totalorder %s1176_s1, %s838_s5 }
 0x1d8   : > { %p1269_p9 = scmp.ne.s32.totalorder %s1256_s29, 0  ;;  %s948_s19 = smov [#allocation9]  }
 0x1d9   : > { %s842_s9 = sshll.u32 %s948_s19, 4  ;;  %s843_s9 = int_to_ptr.vmem [resolvable:$false] %s842_s9 }
 0x1da   : > { %p840_p12 = pnand %p839_p8, %p1269_p9  ;;  %s844_s18 = scalar_lea.vmem %s843_s9, 384 }
 0x1db   : > { %s1181_s2 = scalar_lea.hbm %s1268_s10, %s643_s25  ;;  %p845_p0 = scmp.lt.s32.totalorder %s1176_s1, %s843_s9 }
 0x1dc   : > { %p841_p13 = pneg %p840_p12  ;;  %p846_p1 = scmp.lt.s32.totalorder %s844_s18, %s838_s5 }
 0x1de   : > { %p847_p4 = por %p846_p1, %p845_p0 }
 0x1e0   : > { %p848_p6 = pnand %p847_p4, %p841_p13 }
 0x1e2   : > { %851 = shalt.err (!%p848_p6)
}
 0x1e3   : > { %s852_s11 = scalar_lea.hbm %s1181_s2, 192  ;;  %s856_s13 = scalar_lea.hbm %s1268_s10, 1536 }
 0x1e4   : > { %p853_p10 = scmp.ne.s32.totalorder %s1181_s2, %s852_s11  ;;  %p857_p2 = scmp.lt.s32.totalorder %s1181_s2, %s1268_s10 }
 0x1e5   : > { %p858_p3 = scmp.lt.s32.totalorder %s856_s13, %s852_s11 }
 0x1e6   : > { %p854_p11 = pnand %p853_p10, %p1269_p9 }
 0x1e7   : > { %p859_p7 = por %p858_p3, %p857_p2 }
 0x1e8   : > { %p855_p5 = pneg %p854_p11 }
 0x1ea   : > { %p860_p8 = pnand %p859_p7, %p855_p5 }
 0x1ec   : > { %863 = shalt.err (!%p860_p8)
}
 0x1ed   : > { %s949_s26 = smov 64   ;;  %s950_s8 = smov 256  }
 0x1ee   : > { %s951_s7 = smov 4  }
 0x1ef   : > { %690 = dma.vmem_to_hbm [thread:$0]  (%p1269_p9), %s1176_s1, 192, %s1181_s2, %s445_s15, %s949_s26, %s950_s8, %s951_s7  }
 0x1f0 PF: > { %s1270_s22 = sld [smem:[#allocation14_spill]] }
 0x1f1   : > { %s1271_s25 = sld [smem:[#allocation13_spill]] }
 0x1f2   : > { %s1272_s24 = sld [smem:[#allocation15_spill]] }
 0x1f6   : > { %p707_p12 = scmp.ge.s32.totalorder %s1270_s22, 2 }
 0x1f7   : > { %s490_s27 = sand.u32 1, %s1271_s25  }
 0x1f8   : > { %p1273_p13 = scmp.ne.s32.totalorder %s1272_s24, 0  ;;  %s491_s5 = scalar_lea.sflag [#allocation6], %s490_s27 }
 0x1fa   : > { %p701_p0 = pnand %p707_p12, %p1273_p13 }
 0x1fc   : > { %p702_p1 = pneg %p701_p0 }
 0x1fe   : > { %905 = dma.done.wait (%p702_p1), %s491_s5, 192  }
 0x1ff   : > { %907 = vsyncadd (%p702_p1), %s491_s5, 4294967104  ;;  %s22_s22 = sadd.s32 1, %s1270_s22   ;;  %s1274_s29 = sld [smem:[#allocation16_spill]] }
 0x200   : > { %p19_p4 = scmp.ge.s32.totalorder %s22_s22, 10   ;;  %s1275_s30 = sld [smem:[#allocation17_spill]] }
 0x201   : > { %s1276_s15 = smov %s914_s16  ;;  %s1277_s16 = smov %s918_s17 }
 0x202   : > { %s1278_s17 = smov %s1097_s23  ;;  %s1279_s18 = smov %s930_s20 }
 0x203   : > { %s1280_s19 = smov %s934_s21  ;;  %21 = sbr.rel (!%p19_p4) target bundleno = 11 (0xb), region = 109 }
 0x205   : > { %s1281_s20 = smov %s1274_s29 }
 0x206   : > { %s1282_s21 = smov %s1275_s30 }
 0x208   :  { %512 = vsyncpa [#allocation5], 1 }
 0x209   :  { %514 = vsyncpa [#allocation5 + $0x1], 1 }
 0x20a   :  { %515 = vsyncpa [#allocation8], 1 }
 0x20b   :  { %516 = vsyncpa [#allocation6], 1 }
 0x20c   :  { %518 = vsyncpa [#allocation6 + $0x1], 1 }

</bundles_post_ra>
